<compile_context>
chip_gen: v5e
topology: v5e:2x2
jax: 0.10.0
libtpu: 0.0.40
codegen_flags: <defaults>
</compile_context>

<pallas_src>
import jax
import jax.numpy as jnp
from jax.experimental import pallas as pl
from jax.experimental.pallas import tpu as pltpu

_LANE = 128
_SUBLANE = 8
_SMALL_INPUT_BYTES = 1 << 20      # below this, skip the kernel launch


def _cdiv(a, b):
    return (a + b - 1) // b


def _round_up(x, m):
    return ((x + m - 1) // m) * m


def _round_down(x, m):
    return (x // m) * m


def _block_budget_bytes():
    """(block_bytes_target, vmem_limit_bytes) per TPU generation."""
    kind = ""
    try:
        kind = jax.devices()[0].device_kind.lower()
    except Exception:
        pass
    if "v5" in kind:
        return 4 << 20, 48 << 20       # v5e: already HBM-bound at 4 MiB blocks
    if "v6" in kind:
        return 16 << 20, 96 << 20      # v6e: 128 MiB VMEM -> amortize step cost
    return 8 << 20, 48 << 20           # v7x (64 MiB VMEM) and unknown: safe


def normalization(img, mean, std, *, force_pallas=False):
    """(img - mean[:, None, None]) / std[:, None, None] for NCHW img."""
    B, C, H, W = img.shape
    assert mean.shape == (C,) and std.shape == (C,)
    dtype = img.dtype
    itemsize = jnp.dtype(dtype).itemsize

    # Small-input fast path: kernel-launch overhead dominates; let XLA fuse it.
    if not force_pallas and img.size * itemsize < _SMALL_INPUT_BYTES:
        mean_b = mean.astype(jnp.float32).reshape(1, C, 1, 1)
        std_b = std.astype(jnp.float32).reshape(1, C, 1, 1)
        return ((img.astype(jnp.float32) - mean_b) / std_b).astype(dtype)

    rows = B * C
    hw = H * W
    x = img.reshape(rows, hw)          # free: contiguous-dim merge

    # ---- pick (8,128)-aligned block sizes over the *unpadded* array ----
    rows_a = _round_up(rows, _SUBLANE)     # for sizing only; array is unpadded
    hw_a = _round_up(hw, _LANE)
    block_bytes, vmem_limit = _block_budget_bytes()

    strip_bytes = _SUBLANE * hw_a * itemsize
    if strip_bytes <= block_bytes:
        # Full-width lane block: each block is one large, mostly-linear DMA.
        L = hw_a
        R = min(rows_a,
                max(_SUBLANE,
                    _round_down(block_bytes // (hw_a * itemsize), _SUBLANE)))
    else:
        # A single 8-row strip is already over budget: split the lane axis.
        R = _SUBLANE
        L = min(hw_a,
                max(_LANE,
                    _round_down(block_bytes // (_SUBLANE * itemsize), _LANE)))

    grid_r = _cdiv(rows, R)
    grid_l = _cdiv(hw, L)

    # Expose >= 2 "parallel" grid steps when possible (v7x has 2 TensorCores).
    if grid_r * grid_l < 2:
        if rows > _SUBLANE:
            R = _round_up(_cdiv(rows, 2), _SUBLANE)
        elif hw > _LANE:
            L = _round_up(_cdiv(hw_a, 2), _LANE)
        grid_r = _cdiv(rows, R)
        grid_l = _cdiv(hw, L)

    # ---- per-row mean / (1/std) columns, f32, resident in VMEM ----
    # Padded to grid_r * R rows so the in-kernel dynamic slice stays in bounds
    # (padding a (B*C,)-sized vector is negligible; the image is NOT padded).
    n_stat = grid_r * R
    pad_n = n_stat - rows
    mean_rows = jnp.tile(mean.astype(jnp.float32), B)
    inv_rows = jnp.tile((1.0 / std).astype(jnp.float32), B)
    mean_col = jnp.pad(mean_rows, (0, pad_n)).reshape(n_stat, 1)
    inv_col = jnp.pad(inv_rows, (0, pad_n),
                      constant_values=1.0).reshape(n_stat, 1)

    def kernel(mean_ref, inv_ref, x_ref, out_ref):
        # mean_ref / inv_ref: whole (n_stat, 1) f32 columns, resident in VMEM
        # (constant index_map => fetched once).  Slice out this row band.
        r0 = pl.multiple_of(pl.program_id(0) * R, _SUBLANE)
        m = mean_ref[pl.ds(r0, R), :]
        s = inv_ref[pl.ds(r0, R), :]
        xv = x_ref[...].astype(jnp.float32)
        out_ref[...] = ((xv - m) * s).astype(out_ref.dtype)

    out = pl.pallas_call(
        kernel,
        out_shape=jax.ShapeDtypeStruct((rows, hw), dtype),
        grid=(grid_r, grid_l),
        in_specs=[
            pl.BlockSpec((n_stat, 1), lambda i, j: (0, 0)),  # mean  (resident)
            pl.BlockSpec((n_stat, 1), lambda i, j: (0, 0)),  # 1/std (resident)
            pl.BlockSpec((R, L), lambda i, j: (i, j)),       # image tile
        ],
        out_specs=pl.BlockSpec((R, L), lambda i, j: (i, j)),
        compiler_params=pltpu.CompilerParams(
            dimension_semantics=("parallel", "parallel"),
            vmem_limit_bytes=vmem_limit,
        ),
    )(mean_col, inv_col, x)

    return out.reshape(B, C, H, W)


def _reference(img, mean, std):
    return (img - mean[None, :, None, None]) / std[None, :, None, None]


if __name__ == "__main__":
    # Deterministic parameters from the module's __init__ (ImageNet stats).
    mean = jnp.array([0.485, 0.456, 0.406], dtype=jnp.float32)
    std = jnp.array([0.229, 0.224, 0.225], dtype=jnp.float32)

    key = jax.random.PRNGKey(0)
    k1, k2, k3 = jax.random.split(key, 3)

    # 1) Small NCHW input (C=3) -- force the Pallas kernel path.
    img_small = jax.random.uniform(k1, (2, 3, 16, 16), dtype=jnp.float32)
    out_small = jax.block_until_ready(
        normalization(img_small, mean, std, force_pallas=True))
    ref_small = _reference(img_small, mean, std)
    assert out_small.shape == ref_small.shape
    assert out_small.dtype == ref_small.dtype
    assert jnp.allclose(out_small, ref_small, atol=1e-5, rtol=1e-5)

    # 1b) Same input through the default (fast-path) route.
    out_fast = jax.block_until_ready(normalization(img_small, mean, std))
    assert jnp.allclose(out_fast, ref_small, atol=1e-5, rtol=1e-5)

    # 2) Ragged shapes (rows % 8 != 0, H*W % 128 != 0) -> edge-block masking,
    #    and a larger batch so the row axis is tiled (dynamic stats slice).
    img_rag = jax.random.uniform(k2, (2, 3, 30, 30), dtype=jnp.float32)
    out_rag = jax.block_until_ready(
        normalization(img_rag, mean, std, force_pallas=True))
    assert jnp.allclose(out_rag, _reference(img_rag, mean, std),
                        atol=1e-5, rtol=1e-5)

    img_b8 = jax.random.uniform(k3, (8, 3, 64, 64), dtype=jnp.float32)
    out_b8 = jax.block_until_ready(
        normalization(img_b8, mean, std, force_pallas=True))
    assert jnp.allclose(out_b8, _reference(img_b8, mean, std),
                        atol=1e-5, rtol=1e-5)

    # 3) Larger input takes the Pallas path automatically (> 1 MiB).
    img_big = jax.random.uniform(key, (2, 3, 224, 224), dtype=jnp.float32)
    out_big = jax.block_until_ready(normalization(img_big, mean, std))
    assert jnp.allclose(out_big, _reference(img_big, mean, std),
                        atol=1e-5, rtol=1e-5)

    print("KERNEL_OK")
</pallas_src>

<mosaic_0001>
module attributes {stable_mosaic.version = 11 : i64} {
  func.func @kernel(%arg0: i32, %arg1: i32, %arg2: memref<8x1xf32, #tpu.memory_space<vmem>>, %arg3: memref<8x1xf32, #tpu.memory_space<vmem>>, %arg4: memref<8x128xf32, #tpu.memory_space<vmem>>, %arg5: memref<8x128xf32, #tpu.memory_space<vmem>>) attributes {dimension_semantics = [#tpu.dimension_semantics<parallel>, #tpu.dimension_semantics<parallel>], iteration_bounds = array<i64: 1, 2>, scalar_prefetch = 0 : i64, scratch_operands = 0 : i64, tpu.core_type = #tpu.core_type<tc>, window_params = [{pipeline_mode = #tpu.pipeline_mode<synchronous>, transform_indices = @transform_0, window_bounds = array<i64: 8, 1>}, {pipeline_mode = #tpu.pipeline_mode<synchronous>, transform_indices = @transform_1, window_bounds = array<i64: 8, 1>}, {transform_indices = @transform_2, window_bounds = array<i64: 8, 128>}, {transform_indices = @transform_3, window_bounds = array<i64: 8, 128>}]} {
    %c8_i32 = arith.constant 8 : i32
    %0 = arith.muli %arg0, %c8_i32 : i32
    %1 = tpu.assume_multiple %0, 8 : i32
    %2 = arith.index_cast %1 : i32 to index
    %c0 = arith.constant 0 : index
    %3 = vector.load %arg2[%2, %c0] : memref<8x1xf32, #tpu.memory_space<vmem>>, vector<8x1xf32>
    %4 = arith.index_cast %1 : i32 to index
    %c0_0 = arith.constant 0 : index
    %5 = vector.load %arg3[%4, %c0_0] : memref<8x1xf32, #tpu.memory_space<vmem>>, vector<8x1xf32>
    %c0_1 = arith.constant 0 : index
    %c0_2 = arith.constant 0 : index
    %6 = vector.load %arg4[%c0_1, %c0_2] : memref<8x128xf32, #tpu.memory_space<vmem>>, vector<8x128xf32>
    %7 = vector.broadcast %3 : vector<8x1xf32> to vector<8x128xf32>
    %8 = arith.subf %6, %7 : vector<8x128xf32>
    %9 = vector.broadcast %5 : vector<8x1xf32> to vector<8x128xf32>
    %10 = arith.mulf %8, %9 : vector<8x128xf32>
    %c0_3 = arith.constant 0 : index
    %c0_4 = arith.constant 0 : index
    %11 = vector.load %arg5[%c0_3, %c0_4] : memref<8x128xf32, #tpu.memory_space<vmem>>, vector<8x128xf32>
    tpu.vector_store %arg5[%c0_3, %c0_4], %10 {strides = array<i32>} : memref<8x128xf32, #tpu.memory_space<vmem>>, vector<8x128xf32>,
    return
  }
  func.func @transform_0(%arg0: i32, %arg1: i32) -> (i32, i32) {
    %c0_i32 = arith.constant 0 : i32
    %c0_i32_0 = arith.constant 0 : i32
    %c0_i32_1 = arith.constant 0 : i32
    return %c0_i32, %c0_i32_0 : i32, i32
  }
  func.func @transform_1(%arg0: i32, %arg1: i32) -> (i32, i32) {
    %c0_i32 = arith.constant 0 : i32
    %c0_i32_0 = arith.constant 0 : i32
    %c0_i32_1 = arith.constant 0 : i32
    return %c0_i32, %c0_i32_0 : i32, i32
  }
  func.func @transform_2(%arg0: i32, %arg1: i32) -> (i32, i32) {
    %c0_i32 = arith.constant 0 : i32
    return %arg0, %arg1 : i32, i32
  }
  func.func @transform_3(%arg0: i32, %arg1: i32) -> (i32, i32) {
    %c0_i32 = arith.constant 0 : i32
    return %arg0, %arg1 : i32, i32
  }
}

</mosaic_0001>

<bundles_post_ra>
// kernel: tpu_custom_call.1
= control target key start
LH: loop header
LB: loop body
LE: loop exit
PB: predicated region body
PF: predicated region fallthrough
CT: control target
= control target key end

     0   :  { %8 = vsyncpa [#allocation3], 0  ;;  %s582_s0 = inlined_call_operand.vmem [shape: f32[8,1], index: 0, kind: input, shape index: {}]   ;;  %s583_s1 = inlined_call_operand.vmem [shape: f32[8,1], index: 1, kind: input, shape index: {}]   ;;  %s584_s2 = inlined_call_operand.vmem [shape: f32[6,256], index: 2, kind: input, shape index: {}]   ;;  %s585_s3 = inlined_call_operand.hbm [shape: f32[6,256], index: 3, kind: output, shape index: {}]  }
   0x1   :  { %10 = vsyncpa [#allocation3 + $0x1], 0  ;;  %s479_s12 = smov 0   ;;  %s481_s13 = smov 0  }
   0x2   :  { %s483_s14 = smov 0   ;;  %s485_s15 = smov 0  }
   0x3   :  { %s487_s16 = smov 0   ;;  %s489_s17 = smov 0  }
   0x4 LB: > { %s310_s18 = sadd.s32 4294967295, %s456_s17   ;;  %s311_s19 = sadd.s32 4294967294, %s456_s17   ;;  %s456_s17 = sphi %s489_s17, %s16_s17   ;;  %s452_s16 = sphi %s487_s16, %s592_s16   ;;  %s448_s15 = sphi %s485_s15, %s591_s15   ;;  %s444_s14 = sphi %s483_s14, %s590_s14   ;;  %s440_s13 = sphi %s481_s13, %s589_s13   ;;  %s436_s12 = sphi %s479_s12, %s588_s12  }
   0x5   : > { %s25_s20 = sadd.s32 1, %s452_s16  ;;  %s107_s21 = sadd.s32 1, %s444_s14 }
   0x6   : > { %p26_p0 = scmp.ge.s32.totalorder %s25_s20, 2  ;;  %p117_p1 = scmp.ne.s32.totalorder %s444_s14, %s440_s13 }
   0x7   : > { %p118_p2 = scmp.eq.s32.totalorder %s310_s18, 1  ;;  %p123_p3 = scmp.ne.s32.totalorder %s440_s13, %s436_s12 }
   0x8   : > { %s594_s20 = smov (%p26_p0, %s25_s20), 0  ;;  %p124_p5 = scmp.eq.s32.totalorder %s311_s19, 1 }
   0x9   : > { %p519_p4 = por %p118_p2, %p117_p1  ;;  %s103_s23 = ssub.s32 %s452_s16, %s594_s20 }
   0xa   : > { %p314_p6 = scmp.ge.s32.totalorder %s456_s17, 1  ;;  %p105_p7 = scmp.eq.s32.totalorder %s103_s23, 0 }
   0xb   : > { %p526_p8 = por %p124_p5, %p123_p3  ;;  %p159_p9 = scmp.lt.s32.totalorder %s456_s17, 3 }
   0xc   : > { %s532_s25 = scalar_select %p105_p7, %s444_s14, %s107_s21  }
   0xd   : > { %p160_p10 = pnand %p314_p6, %p159_p9 }
   0xe   : > { %p188_p11 = scmp.lt.s32.totalorder (!%p160_p10), %s448_s15, 1  ;;  %s183_s4 = sand.u32 (!%p160_p10), 1, %s440_s13  }
   0xf   : > { %163 = sbr.rel (%p160_p10) target bundleno = 150 (0x96), region = 32  ;;  %s315_s6 = sshll.u32 (!%p160_p10), %s183_s4, 3 }
  0x10   : > { %s318_s7 = sshll.u32 (!%p160_p10), %s448_s15, 3  ;;  %s185_s21 = scalar_lea.vmem (!%p160_p10), [#allocation2], %s315_s6 }
  0x11   : > { %s226_s19 = scalar_lea.hbm (!%p160_p10), %s585_s3, %s318_s7  ;;  %s228_s23 = sshll.u32 (!%p160_p10), %s185_s21, 4  ;;  %s229_s23 = int_to_ptr.vmem [resolvable:$true] %s228_s23 }
  0x12   : > { %s230_s26 = sshll.u32 (!%p160_p10), %s226_s19, 4  ;;  %s231_s26 = int_to_ptr.hbm [resolvable:$true] %s230_s26 }
  0x13   : > { %s392_s27 = sshra.s32 (!%p160_p10), %s231_s26, 4  ;;  %s393_s27 = int_to_ptr.hbm [resolvable:$true] %s392_s27 }
  0x14   : > { %v196_v0 = vld [vmem:[%s582_s0] sm:$0xff]  ;;  %v458_v1 = vmov 0   ;;  %s189_s30 = scalar_select %p188_p11, %s448_s15, 1 }
  0x15   : > { %377 = vset.pattern.permute.xlu0 %v458_v1  ;;  %v198_v2 = vld [vmem:[%s583_s1] sm:$0xff]  ;;  %s214_s15 = scalar_lea.sflag [#allocation3], %s183_s4  ;;  %s394_s28 = scalar_lea.hbm %s393_s27, 8 }
  0x16   : > { %202 = vperm.xlu0 %377, %v196_v0   ;;  %s316_s5 = sshll.u32 %s189_s30, 3  ;;  %p395_p12 = scmp.ne.s32.totalorder %s393_s27, %s394_s28 }
  0x17   : > { %s193_s10 = scalar_lea.vmem %s584_s2, %s316_s5  ;;  %s398_s5 = scalar_lea.hbm %s585_s3, 16 }
  0x18   : > { %v199_v4 = vld [vmem:[%s193_s10] sm:$0xff]  ;;  %p396_p13 = pnand %p395_p12, %p519_p4  ;;  %p399_p1 = scmp.lt.s32.totalorder %s393_s27, %s585_s3 }
  0x19   : > { %p400_p2 = scmp.lt.s32.totalorder %s398_s5, %s394_s28 }
  0x1a   : > { %p397_p0 = pneg %p396_p13 }
  0x1b   : > { %p401_p3 = por %p400_p2, %p399_p1 }
  0x1d   : > { %p402_p5 = pnand %p401_p3, %p397_p0 }
  0x1e   : > { %208 = vperm.xlu0 %377, %v198_v2  }
  0x88   : > { %v203_v3 = vpop.permute.xlu0 %202 }
  0x89   : > { %v205_v5 = vsub.f32 %v199_v4, %v203_v3 }
  0x90   : > { %v209_v6 = vpop.permute.xlu0 %208 }
  0x91   : > { %v211_v7 = vmul.f32 %v209_v6, %v205_v5 }
  0x93   : > { %212 = vst [vmem:[%s185_s21] sm:$0xff] %v211_v7 }
  0x94   : > { %405 = shalt.err (!%p402_p5)
}
  0x95   : > { %321 = dma.vmem_to_hbm [thread:$0]  (%p519_p4), %s229_s23, 128, %s231_s26, %s214_s15  }
  0x96 PF: > { %p327_p6 = scmp.ge.s32.totalorder %s456_s17, 2  ;;  %s242_s4 = sand.u32 1, %s436_s12  }
  0x97   : > { %s243_s8 = scalar_lea.sflag [#allocation3], %s242_s4 }
  0x98   : > { %p324_p7 = pnand %p327_p6, %p526_p8 }
  0x9a   : > { %p325_p9 = pneg %p324_p7 }
  0x9c   : > { %431 = dma.done.wait (%p325_p9), %s243_s8, 128  }
  0x9d   : > { %433 = vsyncadd (%p325_p9), %s243_s8, 4294967168  ;;  %s16_s17 = sadd.s32 1, %s456_s17   ;;  %s588_s12 = smov %s440_s13 }
  0x9e   : > { %p13_p10 = scmp.ge.s32.totalorder %s16_s17, 4   ;;  %s589_s13 = smov %s444_s14 }
  0x9f   : > { %s590_s14 = smov %s532_s25  ;;  %s591_s15 = smov %s452_s16 }
  0xa0   : > { %s592_s16 = smov %s594_s20  ;;  %15 = sbr.rel (!%p13_p10) target bundleno = 4 (0x4), region = 69 }
  0xa5   :  { %249 = vsyncpa [#allocation3], 1 }
  0xa6   :  { %251 = vsyncpa [#allocation3 + $0x1], 1 }

</bundles_post_ra>
